<compile_context>
chip_gen: v5e
topology: v5e:2x2
jax: 0.10.0
libtpu: 0.0.40
codegen_flags: <defaults>
</compile_context>

<pallas_src>
import math

import jax
import jax.numpy as jnp
from jax import lax
from jax.experimental import pallas as pl
from jax.experimental.pallas import tpu as pltpu

PROJ_DIM = 32            # proj_dim (small stand-in for 256)
D_PAD = 128              # proj_dim padded to full lane width
NUM_HEADS = 4
VISION_FEATURES = 64     # stand-in for swin num_features
VIS_PAD = 128
BERT_HIDDEN = 48         # stand-in for BERT hidden_size
HID_PAD = 128
PD_PAD = 128             # patch_dim padded to full lane width
VOCAB = 100
PATCH = 4


# ----------------------------------------------------------------------------
# Fused kernel: vision proj+L2, text proj+L2, multi-head cross-attention + L2
# ----------------------------------------------------------------------------
def _medclip_kernel(pooled_ref, cls_ref,
                    pw_ref, pb_ref, vw_ref, vb_ref, tw_ref, tb_ref,
                    wq_ref, wk_ref, wv_ref, wo_ref,
                    bq_ref, bk_ref, bv_ref, bo_ref,
                    sel_ref, selt_ref, kmask_ref,
                    out_ref):
    f32 = jnp.float32
    _, bblk, kp, hid = cls_ref.shape          # (1, batch block, padded phrases, 128)
    dp = wq_ref.shape[0]                      # padded model dim (128)

    # ---------------- vision: (pooled) patch-embed + proj + L2 --------------
    pooled = pooled_ref[0]                                            # (bblk, 128)
    vis = jnp.dot(pooled, pw_ref[...], preferred_element_type=f32) + pb_ref[...]
    img = jnp.dot(vis, vw_ref[...], preferred_element_type=f32) + vb_ref[...]
    img = img * lax.rsqrt(
        jnp.maximum(jnp.sum(img * img, axis=-1, keepdims=True), 1e-24))

    # ---------------- text: per-phrase proj + L2 ----------------------------
    cls = cls_ref[0].reshape(bblk * kp, hid)                          # kp % 8 == 0
    phr = jnp.dot(cls, tw_ref[...], preferred_element_type=f32) + tb_ref[...]
    phr = phr * lax.rsqrt(
        jnp.maximum(jnp.sum(phr * phr, axis=-1, keepdims=True), 1e-24))

    # ---------------- cross attention: q = img, kv = phrases ----------------
    # wq/bq are pre-scaled by 1/sqrt(head_dim) at init time.
    qp = jnp.dot(img, wq_ref[...], preferred_element_type=f32) + bq_ref[...]   # (bblk, dp)
    kk = jnp.dot(phr, wk_ref[...], preferred_element_type=f32) + bk_ref[...]   # (bblk*kp, dp)
    vv = jnp.dot(phr, wv_ref[...], preferred_element_type=f32) + bv_ref[...]   # (bblk*kp, dp)

    # Per-lane q*k product via sublane broadcast, then a constant block-diagonal
    # head-selector matmul reduces each head's lanes to one score column.
    prod = kk.reshape(bblk, kp, dp) * qp[:, None, :]                  # (bblk, kp, dp)
    scores = jnp.dot(prod.reshape(bblk * kp, dp), sel_ref[...],
                     preferred_element_type=f32).reshape(bblk, kp, dp)
    scores = scores + kmask_ref[...]                                  # mask padded phrases

    m = jnp.max(scores, axis=1, keepdims=True)                        # softmax over phrases
    e = jnp.exp(scores - m)
    attn = e * pl.reciprocal(jnp.sum(e, axis=1, keepdims=True), approx=True)

    # Broadcast per-head attention weights back to their head's lanes.
    wfull = jnp.dot(attn.reshape(bblk * kp, dp), selt_ref[...],
                    preferred_element_type=f32)                       # (bblk*kp, dp)
    ctx = jnp.sum((wfull * vv).reshape(bblk, kp, dp), axis=1)         # (bblk, dp)

    out = jnp.dot(ctx, wo_ref[...], preferred_element_type=f32) + bo_ref[...]
    out = out * lax.rsqrt(
        jnp.maximum(jnp.sum(out * out, axis=-1, keepdims=True), 1e-24))

    # Single combined lane-dense output slab: [0] = image features, [1] = text.
    out_ref[0, 0] = img.astype(out_ref.dtype)
    out_ref[0, 1] = out.astype(out_ref.dtype)


def _num_batch_blocks(b):
    """Split the batch across grid steps only on 2-TensorCore chips (v7x)."""
    try:
        kind = jax.devices()[0].device_kind.lower()
    except Exception:
        kind = ""
    two_tc = ("v7" in kind) or ("7x" in kind) or ("tpu7" in kind)
    return 2 if (two_tc and b % 2 == 0 and b >= 2) else 1


# ----------------------------------------------------------------------------
# Forward wrapper
# ----------------------------------------------------------------------------
def med_clip_forward(params, images, input_ids, attention_mask):
    b, c, h, w = images.shape
    ph, pw_ = h // PATCH, w // PATCH
    p = ph * pw_
    patch_dim = c * PATCH * PATCH

    # ---- vision stand-in front-end: patch extraction + global avg pool -----
    # TODO(synk): pretrained timm Swin backbone replaced by a deterministic
    #             patch-embedding + global-average-pool stand-in.
    # Pool BEFORE the patch-embed linear (mean(x)W + b == mean(xW + b)): the
    # kernel only sees a (b, 128) lane-dense pooled tensor.
    patches = images.reshape(b, c, ph, PATCH, pw_, PATCH)
    patches = patches.transpose(0, 2, 4, 1, 3, 5).reshape(b, p, patch_dim)
    pooled = jnp.mean(patches.astype(jnp.float32), axis=1)             # (b, patch_dim)
    pooled = jnp.pad(pooled, ((0, 0), (0, PD_PAD - patch_dim)))        # (b, 128)

    # ---- text stand-in front-end: token embedding gather + masked mean -----
    # TODO(synk): pretrained Bio_ClinicalBERT CLS extraction replaced by a
    #             deterministic embedding + masked-mean stand-in; the
    #             data-dependent gather stays in XLA.
    bt, k, l = input_ids.shape
    ids = input_ids.reshape(bt * k, l)
    mask = attention_mask.reshape(bt * k, l).astype(jnp.float32)
    emb = params["tok_emb"][ids]                                       # (B*K, L, 128)
    cls = jnp.sum(emb * mask[..., None], axis=1) / jnp.maximum(
        jnp.sum(mask, axis=1, keepdims=True), 1.0)                     # (B*K, 128)
    kpad = max(8, -(-k // 8) * 8)                                      # pad phrase axis to sublanes
    cls = cls.reshape(bt, k, HID_PAD)
    if kpad != k:
        cls = jnp.pad(cls, ((0, 0), (0, kpad - k), (0, 0)))

    nblk = _num_batch_blocks(b)
    bblk = b // nblk
    pooled = pooled.reshape(nblk, bblk, PD_PAD)
    cls = cls.reshape(nblk, bblk, kpad, HID_PAD)

    # Additive phrase-padding mask (constant per compile), hoisted out of kernel.
    kmask_add = (jnp.where(jnp.arange(kpad)[:, None] < k, 0.0, -1e30)
                 .astype(jnp.float32) + jnp.zeros((kpad, D_PAD), jnp.float32))

    consts = (params["patch_w"], params["patch_b"],
              params["vis_proj_w"], params["vis_proj_b"],
              params["txt_proj_w"], params["txt_proj_b"],
              params["attn_wq"], params["attn_wk"],
              params["attn_wv"], params["attn_wo"],
              params["attn_bq"], params["attn_bk"],
              params["attn_bv"], params["attn_bo"],
              params["head_sel"], params["head_selt"], kmask_add)

    def _wspec(arr):
        nd = arr.ndim
        return pl.BlockSpec(arr.shape, lambda i, _n=nd: (0,) * _n)     # resident across steps

    out = pl.pallas_call(
        _medclip_kernel,
        grid=(nblk,),
        in_specs=[
            pl.BlockSpec((1, bblk, PD_PAD), lambda i: (i, 0, 0)),
            pl.BlockSpec((1, bblk, kpad, HID_PAD), lambda i: (i, 0, 0, 0)),
        ] + [_wspec(a) for a in consts],
        out_specs=pl.BlockSpec((1, 2, bblk, D_PAD), lambda i: (i, 0, 0, 0)),
        out_shape=jax.ShapeDtypeStruct((nblk, 2, bblk, D_PAD), jnp.float32),
        compiler_params=pltpu.CompilerParams(
            dimension_semantics=("parallel",)),
    )(pooled, cls, *consts)

    img_feat = out[:, 0].reshape(b, D_PAD)[:, :PROJ_DIM]
    txt_feat = out[:, 1].reshape(b, D_PAD)[:, :PROJ_DIM]
    return img_feat, txt_feat


# ----------------------------------------------------------------------------
# Parameters (stored once in kernel-ready layout: transposed + lane-padded)
# ----------------------------------------------------------------------------
def _to_kernel_linear(w, b, in_pad, out_pad):
    """torch Linear weight (out,in) + bias (out,) -> ((in_pad,out_pad), (1,out_pad))."""
    o, i = w.shape
    wt = jnp.zeros((in_pad, out_pad), jnp.float32).at[:i, :o].set(w.T)
    bp = jnp.zeros((1, out_pad), jnp.float32).at[0, :o].set(b)
    return wt, bp


def init_params(key):
    ks = jax.random.split(key, 10)
    s = 0.02
    patch_dim = 3 * PATCH * PATCH
    hd = PROJ_DIM // NUM_HEADS

    patch_w = s * jax.random.normal(ks[0], (VISION_FEATURES, patch_dim), jnp.float32)
    patch_b = jnp.zeros((VISION_FEATURES,), jnp.float32)
    vis_w = s * jax.random.normal(ks[1], (PROJ_DIM, VISION_FEATURES), jnp.float32)
    vis_b = s * jax.random.normal(ks[2], (PROJ_DIM,), jnp.float32)
    tok = s * jax.random.normal(ks[3], (VOCAB, BERT_HIDDEN), jnp.float32)
    txt_w = s * jax.random.normal(ks[4], (PROJ_DIM, BERT_HIDDEN), jnp.float32)
    txt_b = s * jax.random.normal(ks[5], (PROJ_DIM,), jnp.float32)
    in_w = s * jax.random.normal(ks[6], (3 * PROJ_DIM, PROJ_DIM), jnp.float32)
    in_b = s * jax.random.normal(ks[7], (3 * PROJ_DIM,), jnp.float32)
    out_w = s * jax.random.normal(ks[8], (PROJ_DIM, PROJ_DIM), jnp.float32)
    out_b = s * jax.random.normal(ks[9], (PROJ_DIM,), jnp.float32)

    pw, pb = _to_kernel_linear(patch_w, patch_b, PD_PAD, VIS_PAD)
    vw, vb = _to_kernel_linear(vis_w, vis_b, VIS_PAD, D_PAD)
    tw, tb = _to_kernel_linear(txt_w, txt_b, HID_PAD, D_PAD)
    # Fold the 1/sqrt(head_dim) attention scale into the q projection.
    scale = 1.0 / math.sqrt(hd)
    wq, bq = _to_kernel_linear(in_w[:PROJ_DIM] * scale,
                               in_b[:PROJ_DIM] * scale, D_PAD, D_PAD)
    wk, bk = _to_kernel_linear(in_w[PROJ_DIM:2 * PROJ_DIM],
                               in_b[PROJ_DIM:2 * PROJ_DIM], D_PAD, D_PAD)
    wv, bv = _to_kernel_linear(in_w[2 * PROJ_DIM:], in_b[2 * PROJ_DIM:], D_PAD, D_PAD)
    wo, bo = _to_kernel_linear(out_w, out_b, D_PAD, D_PAD)

    tok_emb = jnp.zeros((VOCAB, HID_PAD), jnp.float32).at[:, :BERT_HIDDEN].set(tok)

    # Constant block-diagonal head selectors (built once, passed as weights).
    di = jnp.arange(D_PAD)[:, None]
    dj = jnp.arange(D_PAD)[None, :]
    head_sel = ((di < PROJ_DIM) & (dj == di // hd)).astype(jnp.float32)   # feature d -> head col
    head_selt = ((dj < PROJ_DIM) & (di == dj // hd)).astype(jnp.float32)  # head col -> feature d

    return {
        "patch_w": pw, "patch_b": pb,
        "vis_proj_w": vw, "vis_proj_b": vb,
        "tok_emb": tok_emb,
        "txt_proj_w": tw, "txt_proj_b": tb,
        "attn_wq": wq, "attn_wk": wk, "attn_wv": wv, "attn_wo": wo,
        "attn_bq": bq, "attn_bk": bk, "attn_bv": bv, "attn_bo": bo,
        "head_sel": head_sel, "head_selt": head_selt,
        # logit_scale is a module parameter but unused in forward()
        "logit_scale": jnp.array(math.log(1.0 / 0.07), jnp.float32),
    }


# ----------------------------------------------------------------------------
# Pure-JAX reference of the same stand-in math (for a correctness check)
# ----------------------------------------------------------------------------
def _reference_forward(params, images, input_ids, attention_mask):
    b, c, h, w = images.shape
    ph, pw_ = h // PATCH, w // PATCH
    patch_dim = c * PATCH * PATCH
    patches = images.reshape(b, c, ph, PATCH, pw_, PATCH)
    patches = patches.transpose(0, 2, 4, 1, 3, 5).reshape(b, ph * pw_, patch_dim)
    feat = (patches @ params["patch_w"][:patch_dim, :VISION_FEATURES]
            + params["patch_b"][:, :VISION_FEATURES])
    vis = feat.mean(axis=1)
    img = vis @ params["vis_proj_w"][:VISION_FEATURES, :PROJ_DIM] + params["vis_proj_b"][:, :PROJ_DIM]
    img = img / jnp.maximum(jnp.linalg.norm(img, axis=-1, keepdims=True), 1e-12)

    bt, k, l = input_ids.shape
    ids = input_ids.reshape(bt * k, l)
    mask = attention_mask.reshape(bt * k, l).astype(jnp.float32)
    emb = params["tok_emb"][ids][..., :BERT_HIDDEN]
    cls = (emb * mask[..., None]).sum(1) / jnp.maximum(mask.sum(1, keepdims=True), 1.0)
    phr = cls @ params["txt_proj_w"][:BERT_HIDDEN, :PROJ_DIM] + params["txt_proj_b"][:, :PROJ_DIM]
    phr = phr / jnp.maximum(jnp.linalg.norm(phr, axis=-1, keepdims=True), 1e-12)
    phr = phr.reshape(bt, k, PROJ_DIM)

    d, hd = PROJ_DIM, PROJ_DIM // NUM_HEADS
    # attn_wq / attn_bq are already pre-scaled by 1/sqrt(hd) in init_params.
    q = img @ params["attn_wq"][:d, :d] + params["attn_bq"][:, :d]
    kk = phr @ params["attn_wk"][:d, :d] + params["attn_bk"][:, :d]
    vv = phr @ params["attn_wv"][:d, :d] + params["attn_bv"][:, :d]
    qh = q.reshape(b, NUM_HEADS, hd)
    kh = kk.reshape(b, k, NUM_HEADS, hd)
    vh = vv.reshape(b, k, NUM_HEADS, hd)
    s = jnp.einsum("bhd,bkhd->bhk", qh, kh)
    p = jax.nn.softmax(s, axis=-1)
    ctx = jnp.einsum("bhk,bkhd->bhd", p, vh).reshape(b, d)
    out = ctx @ params["attn_wo"][:d, :d] + params["attn_bo"][:, :d]
    out = out / jnp.maximum(jnp.linalg.norm(out, axis=-1, keepdims=True), 1e-12)
    return img, out


if __name__ == "__main__":
    key = jax.random.PRNGKey(0)
    k_par, k_img, k_ids, k_msk = jax.random.split(key, 4)
    params = init_params(k_par)

    B, C, H, W = 4, 3, 16, 16          # images, NCHW
    K, L = 3, 8                        # K phrases of length L per sample
    images = jax.random.normal(k_img, (B, C, H, W), jnp.float32)
    input_ids = jax.random.randint(k_ids, (B, K, L), 0, VOCAB)
    attention_mask = (jax.random.uniform(k_msk, (B, K, L)) > 0.2).astype(jnp.int32)
    attention_mask = attention_mask.at[..., 0].set(1)

    fwd = jax.jit(med_clip_forward)
    img_feat, txt_feat = fwd(params, images, input_ids, attention_mask)
    jax.block_until_ready((img_feat, txt_feat))

    assert img_feat.shape == (B, PROJ_DIM)
    assert txt_feat.shape == (B, PROJ_DIM)

    ref_img, ref_txt = _reference_forward(params, images, input_ids, attention_mask)
    assert bool(jnp.allclose(img_feat, ref_img, atol=1e-2, rtol=1e-2))
    assert bool(jnp.allclose(txt_feat, ref_txt, atol=1e-2, rtol=1e-2))

    print("KERNEL_OK")
</pallas_src>

<mosaic_0001>
module attributes {stable_mosaic.version = 11 : i64} {
  func.func @_medclip_kernel(%arg0: i32, %arg1: memref<1x4x128xf32, #tpu.memory_space<vmem>>, %arg2: memref<1x4x8x128xf32, #tpu.memory_space<vmem>>, %arg3: memref<128x128xf32, #tpu.memory_space<vmem>>, %arg4: memref<1x128xf32, #tpu.memory_space<vmem>>, %arg5: memref<128x128xf32, #tpu.memory_space<vmem>>, %arg6: memref<1x128xf32, #tpu.memory_space<vmem>>, %arg7: memref<128x128xf32, #tpu.memory_space<vmem>>, %arg8: memref<1x128xf32, #tpu.memory_space<vmem>>, %arg9: memref<128x128xf32, #tpu.memory_space<vmem>>, %arg10: memref<128x128xf32, #tpu.memory_space<vmem>>, %arg11: memref<128x128xf32, #tpu.memory_space<vmem>>, %arg12: memref<128x128xf32, #tpu.memory_space<vmem>>, %arg13: memref<1x128xf32, #tpu.memory_space<vmem>>, %arg14: memref<1x128xf32, #tpu.memory_space<vmem>>, %arg15: memref<1x128xf32, #tpu.memory_space<vmem>>, %arg16: memref<1x128xf32, #tpu.memory_space<vmem>>, %arg17: memref<128x128xf32, #tpu.memory_space<vmem>>, %arg18: memref<128x128xf32, #tpu.memory_space<vmem>>, %arg19: memref<8x128xf32, #tpu.memory_space<vmem>>, %arg20: memref<1x2x4x128xf32, #tpu.memory_space<vmem>>) attributes {dimension_semantics = [#tpu.dimension_semantics<parallel>], iteration_bounds = array<i64: 1>, scalar_prefetch = 0 : i64, scratch_operands = 0 : i64, tpu.core_type = #tpu.core_type<tc>, window_params = [{transform_indices = @transform_0, window_bounds = array<i64: 1, 4, 128>}, {transform_indices = @transform_1, window_bounds = array<i64: 1, 4, 8, 128>}, {pipeline_mode = #tpu.pipeline_mode<synchronous>, transform_indices = @transform_2, window_bounds = array<i64: 128, 128>}, {pipeline_mode = #tpu.pipeline_mode<synchronous>, transform_indices = @transform_3, window_bounds = array<i64: 1, 128>}, {pipeline_mode = #tpu.pipeline_mode<synchronous>, transform_indices = @transform_4, window_bounds = array<i64: 128, 128>}, {pipeline_mode = #tpu.pipeline_mode<synchronous>, transform_indices = @transform_5, window_bounds = array<i64: 1, 128>}, {pipeline_mode = #tpu.pipeline_mode<synchronous>, transform_indices = @transform_6, window_bounds = array<i64: 128, 128>}, {pipeline_mode = #tpu.pipeline_mode<synchronous>, transform_indices = @transform_7, window_bounds = array<i64: 1, 128>}, {pipeline_mode = #tpu.pipeline_mode<synchronous>, transform_indices = @transform_8, window_bounds = array<i64: 128, 128>}, {pipeline_mode = #tpu.pipeline_mode<synchronous>, transform_indices = @transform_9, window_bounds = array<i64: 128, 128>}, {pipeline_mode = #tpu.pipeline_mode<synchronous>, transform_indices = @transform_10, window_bounds = array<i64: 128, 128>}, {pipeline_mode = #tpu.pipeline_mode<synchronous>, transform_indices = @transform_11, window_bounds = array<i64: 128, 128>}, {pipeline_mode = #tpu.pipeline_mode<synchronous>, transform_indices = @transform_12, window_bounds = array<i64: 1, 128>}, {pipeline_mode = #tpu.pipeline_mode<synchronous>, transform_indices = @transform_13, window_bounds = array<i64: 1, 128>}, {pipeline_mode = #tpu.pipeline_mode<synchronous>, transform_indices = @transform_14, window_bounds = array<i64: 1, 128>}, {pipeline_mode = #tpu.pipeline_mode<synchronous>, transform_indices = @transform_15, window_bounds = array<i64: 1, 128>}, {pipeline_mode = #tpu.pipeline_mode<synchronous>, transform_indices = @transform_16, window_bounds = array<i64: 128, 128>}, {pipeline_mode = #tpu.pipeline_mode<synchronous>, transform_indices = @transform_17, window_bounds = array<i64: 128, 128>}, {pipeline_mode = #tpu.pipeline_mode<synchronous>, transform_indices = @transform_18, window_bounds = array<i64: 8, 128>}, {transform_indices = @transform_19, window_bounds = array<i64: 1, 2, 4, 128>}]} {
    %c0 = arith.constant 0 : index
    %c0_0 = arith.constant 0 : index
    %c0_1 = arith.constant 0 : index
    %0 = vector.load %arg1[%c0, %c0_0, %c0_1] : memref<1x4x128xf32, #tpu.memory_space<vmem>>, vector<1x4x128xf32>
    %1 = vector.shape_cast %0 : vector<1x4x128xf32> to vector<4x128xf32>
    %c0_2 = arith.constant 0 : index
    %c0_3 = arith.constant 0 : index
    %2 = vector.load %arg3[%c0_2, %c0_3] : memref<128x128xf32, #tpu.memory_space<vmem>>, vector<128x128xf32>
    %cst = arith.constant dense<0.000000e+00> : vector<4x128xf32>
    %3 = tpu.matmul %1, %2, %cst {dimension_numbers = #tpu.dot_dimension_numbers<[1], [0], [0], [1], [0, 0, 1, 1], [], []>} : vector<4x128xf32>, vector<128x128xf32>, vector<4x128xf32> -> vector<4x128xf32>
    %c0_4 = arith.constant 0 : index
    %c0_5 = arith.constant 0 : index
    %4 = vector.load %arg4[%c0_4, %c0_5] : memref<1x128xf32, #tpu.memory_space<vmem>>, vector<1x128xf32>
    %5 = vector.broadcast %4 : vector<1x128xf32> to vector<4x128xf32>
    %6 = arith.addf %3, %5 : vector<4x128xf32>
    %c0_6 = arith.constant 0 : index
    %c0_7 = arith.constant 0 : index
    %7 = vector.load %arg5[%c0_6, %c0_7] : memref<128x128xf32, #tpu.memory_space<vmem>>, vector<128x128xf32>
    %cst_8 = arith.constant dense<0.000000e+00> : vector<4x128xf32>
    %8 = tpu.matmul %6, %7, %cst_8 {dimension_numbers = #tpu.dot_dimension_numbers<[1], [0], [0], [1], [0, 0, 1, 1], [], []>} : vector<4x128xf32>, vector<128x128xf32>, vector<4x128xf32> -> vector<4x128xf32>
    %c0_9 = arith.constant 0 : index
    %c0_10 = arith.constant 0 : index
    %9 = vector.load %arg6[%c0_9, %c0_10] : memref<1x128xf32, #tpu.memory_space<vmem>>, vector<1x128xf32>
    %10 = vector.broadcast %9 : vector<1x128xf32> to vector<4x128xf32>
    %11 = arith.addf %8, %10 : vector<4x128xf32>
    %12 = arith.mulf %11, %11 : vector<4x128xf32>
    %cst_11 = arith.constant dense<0.000000e+00> : vector<4xf32>
    %13 = vector.multi_reduction <add>, %12, %cst_11 [1] : vector<4x128xf32> to vector<4xf32>
    %14 = vector.shape_cast %13 : vector<4xf32> to vector<4x1xf32>
    %cst_12 = arith.constant 1.000000e-24 : f32
    %15 = vector.broadcast %cst_12 : f32 to vector<4x1xf32>
    %16 = arith.maximumf %14, %15 : vector<4x1xf32>
    %17 = math.rsqrt %16 : vector<4x1xf32>
    %18 = vector.broadcast %17 : vector<4x1xf32> to vector<4x128xf32>
    %19 = arith.mulf %11, %18 : vector<4x128xf32>
    %c0_13 = arith.constant 0 : index
    %c0_14 = arith.constant 0 : index
    %c0_15 = arith.constant 0 : index
    %c0_16 = arith.constant 0 : index
    %20 = vector.load %arg2[%c0_13, %c0_14, %c0_15, %c0_16] : memref<1x4x8x128xf32, #tpu.memory_space<vmem>>, vector<1x4x8x128xf32>
    %21 = vector.shape_cast %20 : vector<1x4x8x128xf32> to vector<4x8x128xf32>
    %22 = vector.shape_cast %21 : vector<4x8x128xf32> to vector<32x128xf32>
    %c0_17 = arith.constant 0 : index
    %c0_18 = arith.constant 0 : index
    %23 = vector.load %arg7[%c0_17, %c0_18] : memref<128x128xf32, #tpu.memory_space<vmem>>, vector<128x128xf32>
    %cst_19 = arith.constant dense<0.000000e+00> : vector<32x128xf32>
    %24 = tpu.matmul %22, %23, %cst_19 {dimension_numbers = #tpu.dot_dimension_numbers<[1], [0], [0], [1], [0, 0, 1, 1], [], []>} : vector<32x128xf32>, vector<128x128xf32>, vector<32x128xf32> -> vector<32x128xf32>
    %c0_20 = arith.constant 0 : index
    %c0_21 = arith.constant 0 : index
    %25 = vector.load %arg8[%c0_20, %c0_21] : memref<1x128xf32, #tpu.memory_space<vmem>>, vector<1x128xf32>
    %26 = vector.broadcast %25 : vector<1x128xf32> to vector<32x128xf32>
    %27 = arith.addf %24, %26 : vector<32x128xf32>
    %28 = arith.mulf %27, %27 : vector<32x128xf32>
    %cst_22 = arith.constant dense<0.000000e+00> : vector<32xf32>
    %29 = vector.multi_reduction <add>, %28, %cst_22 [1] : vector<32x128xf32> to vector<32xf32>
    %30 = vector.shape_cast %29 : vector<32xf32> to vector<32x1xf32>
    %cst_23 = arith.constant 1.000000e-24 : f32
    %31 = vector.broadcast %cst_23 : f32 to vector<32x1xf32>
    %32 = arith.maximumf %30, %31 : vector<32x1xf32>
    %33 = math.rsqrt %32 : vector<32x1xf32>
    %34 = vector.broadcast %33 : vector<32x1xf32> to vector<32x128xf32>
    %35 = arith.mulf %27, %34 : vector<32x128xf32>
    %c0_24 = arith.constant 0 : index
    %c0_25 = arith.constant 0 : index
    %36 = vector.load %arg9[%c0_24, %c0_25] : memref<128x128xf32, #tpu.memory_space<vmem>>, vector<128x128xf32>
    %cst_26 = arith.constant dense<0.000000e+00> : vector<4x128xf32>
    %37 = tpu.matmul %19, %36, %cst_26 {dimension_numbers = #tpu.dot_dimension_numbers<[1], [0], [0], [1], [0, 0, 1, 1], [], []>} : vector<4x128xf32>, vector<128x128xf32>, vector<4x128xf32> -> vector<4x128xf32>
    %c0_27 = arith.constant 0 : index
    %c0_28 = arith.constant 0 : index
    %38 = vector.load %arg13[%c0_27, %c0_28] : memref<1x128xf32, #tpu.memory_space<vmem>>, vector<1x128xf32>
    %39 = vector.broadcast %38 : vector<1x128xf32> to vector<4x128xf32>
    %40 = arith.addf %37, %39 : vector<4x128xf32>
    %c0_29 = arith.constant 0 : index
    %c0_30 = arith.constant 0 : index
    %41 = vector.load %arg10[%c0_29, %c0_30] : memref<128x128xf32, #tpu.memory_space<vmem>>, vector<128x128xf32>
    %cst_31 = arith.constant dense<0.000000e+00> : vector<32x128xf32>
    %42 = tpu.matmul %35, %41, %cst_31 {dimension_numbers = #tpu.dot_dimension_numbers<[1], [0], [0], [1], [0, 0, 1, 1], [], []>} : vector<32x128xf32>, vector<128x128xf32>, vector<32x128xf32> -> vector<32x128xf32>
    %c0_32 = arith.constant 0 : index
    %c0_33 = arith.constant 0 : index
    %43 = vector.load %arg14[%c0_32, %c0_33] : memref<1x128xf32, #tpu.memory_space<vmem>>, vector<1x128xf32>
    %44 = vector.broadcast %43 : vector<1x128xf32> to vector<32x128xf32>
    %45 = arith.addf %42, %44 : vector<32x128xf32>
    %c0_34 = arith.constant 0 : index
    %c0_35 = arith.constant 0 : index
    %46 = vector.load %arg11[%c0_34, %c0_35] : memref<128x128xf32, #tpu.memory_space<vmem>>, vector<128x128xf32>
    %cst_36 = arith.constant dense<0.000000e+00> : vector<32x128xf32>
    %47 = tpu.matmul %35, %46, %cst_36 {dimension_numbers = #tpu.dot_dimension_numbers<[1], [0], [0], [1], [0, 0, 1, 1], [], []>} : vector<32x128xf32>, vector<128x128xf32>, vector<32x128xf32> -> vector<32x128xf32>
    %c0_37 = arith.constant 0 : index
    %c0_38 = arith.constant 0 : index
    %48 = vector.load %arg15[%c0_37, %c0_38] : memref<1x128xf32, #tpu.memory_space<vmem>>, vector<1x128xf32>
    %49 = vector.broadcast %48 : vector<1x128xf32> to vector<32x128xf32>
    %50 = arith.addf %47, %49 : vector<32x128xf32>
    %51 = vector.shape_cast %45 : vector<32x128xf32> to vector<4x8x128xf32>
    %52 = vector.shape_cast %40 : vector<4x128xf32> to vector<4x1x128xf32>
    %53 = vector.broadcast %52 : vector<4x1x128xf32> to vector<4x8x128xf32>
    %54 = arith.mulf %51, %53 : vector<4x8x128xf32>
    %55 = vector.shape_cast %54 : vector<4x8x128xf32> to vector<32x128xf32>
    %c0_39 = arith.constant 0 : index
    %c0_40 = arith.constant 0 : index
    %56 = vector.load %arg17[%c0_39, %c0_40] : memref<128x128xf32, #tpu.memory_space<vmem>>, vector<128x128xf32>
    %cst_41 = arith.constant dense<0.000000e+00> : vector<32x128xf32>
    %57 = tpu.matmul %55, %56, %cst_41 {dimension_numbers = #tpu.dot_dimension_numbers<[1], [0], [0], [1], [0, 0, 1, 1], [], []>} : vector<32x128xf32>, vector<128x128xf32>, vector<32x128xf32> -> vector<32x128xf32>
    %58 = vector.shape_cast %57 : vector<32x128xf32> to vector<4x8x128xf32>
    %c0_42 = arith.constant 0 : index
    %c0_43 = arith.constant 0 : index
    %59 = vector.load %arg19[%c0_42, %c0_43] : memref<8x128xf32, #tpu.memory_space<vmem>>, vector<8x128xf32>
    %60 = vector.shape_cast %59 : vector<8x128xf32> to vector<1x8x128xf32>
    %61 = vector.broadcast %60 : vector<1x8x128xf32> to vector<4x8x128xf32>
    %62 = arith.addf %58, %61 : vector<4x8x128xf32>
    %cst_44 = arith.constant dense<0xFF800000> : vector<4x128xf32>
    %63 = vector.multi_reduction <maximumf>, %62, %cst_44 [1] : vector<4x8x128xf32> to vector<4x128xf32>
    %64 = vector.shape_cast %63 : vector<4x128xf32> to vector<4x1x128xf32>
    %65 = vector.broadcast %64 : vector<4x1x128xf32> to vector<4x8x128xf32>
    %66 = arith.subf %62, %65 : vector<4x8x128xf32>
    %67 = math.exp %66 : vector<4x8x128xf32>
    %cst_45 = arith.constant dense<0.000000e+00> : vector<4x128xf32>
    %68 = vector.multi_reduction <add>, %67, %cst_45 [1] : vector<4x8x128xf32> to vector<4x128xf32>
    %69 = vector.shape_cast %68 : vector<4x128xf32> to vector<4x1x128xf32>
    %70 = tpu.reciprocal %69 {approx = true} : vector<4x1x128xf32> -> vector<4x1x128xf32>
    %71 = vector.broadcast %70 : vector<4x1x128xf32> to vector<4x8x128xf32>
    %72 = arith.mulf %67, %71 : vector<4x8x128xf32>
    %73 = vector.shape_cast %72 : vector<4x8x128xf32> to vector<32x128xf32>
    %c0_46 = arith.constant 0 : index
    %c0_47 = arith.constant 0 : index
    %74 = vector.load %arg18[%c0_46, %c0_47] : memref<128x128xf32, #tpu.memory_space<vmem>>, vector<128x128xf32>
    %cst_48 = arith.constant dense<0.000000e+00> : vector<32x128xf32>
    %75 = tpu.matmul %73, %74, %cst_48 {dimension_numbers = #tpu.dot_dimension_numbers<[1], [0], [0], [1], [0, 0, 1, 1], [], []>} : vector<32x128xf32>, vector<128x128xf32>, vector<32x128xf32> -> vector<32x128xf32>
    %76 = arith.mulf %75, %50 : vector<32x128xf32>
    %77 = vector.shape_cast %76 : vector<32x128xf32> to vector<4x8x128xf32>
    %cst_49 = arith.constant dense<0.000000e+00> : vector<4x128xf32>
    %78 = vector.multi_reduction <add>, %77, %cst_49 [1] : vector<4x8x128xf32> to vector<4x128xf32>
    %c0_50 = arith.constant 0 : index
    %c0_51 = arith.constant 0 : index
    %79 = vector.load %arg12[%c0_50, %c0_51] : memref<128x128xf32, #tpu.memory_space<vmem>>, vector<128x128xf32>
    %cst_52 = arith.constant dense<0.000000e+00> : vector<4x128xf32>
    %80 = tpu.matmul %78, %79, %cst_52 {dimension_numbers = #tpu.dot_dimension_numbers<[1], [0], [0], [1], [0, 0, 1, 1], [], []>} : vector<4x128xf32>, vector<128x128xf32>, vector<4x128xf32> -> vector<4x128xf32>
    %c0_53 = arith.constant 0 : index
    %c0_54 = arith.constant 0 : index
    %81 = vector.load %arg16[%c0_53, %c0_54] : memref<1x128xf32, #tpu.memory_space<vmem>>, vector<1x128xf32>
    %82 = vector.broadcast %81 : vector<1x128xf32> to vector<4x128xf32>
    %83 = arith.addf %80, %82 : vector<4x128xf32>
    %84 = arith.mulf %83, %83 : vector<4x128xf32>
    %cst_55 = arith.constant dense<0.000000e+00> : vector<4xf32>
    %85 = vector.multi_reduction <add>, %84, %cst_55 [1] : vector<4x128xf32> to vector<4xf32>
    %86 = vector.shape_cast %85 : vector<4xf32> to vector<4x1xf32>
    %cst_56 = arith.constant 1.000000e-24 : f32
    %87 = vector.broadcast %cst_56 : f32 to vector<4x1xf32>
    %88 = arith.maximumf %86, %87 : vector<4x1xf32>
    %89 = math.rsqrt %88 : vector<4x1xf32>
    %90 = vector.broadcast %89 : vector<4x1xf32> to vector<4x128xf32>
    %91 = arith.mulf %83, %90 : vector<4x128xf32>
    %c0_57 = arith.constant 0 : index
    %c0_58 = arith.constant 0 : index
    %c0_59 = arith.constant 0 : index
    %c0_60 = arith.constant 0 : index
    %92 = vector.load %arg20[%c0_57, %c0_58, %c0_59, %c0_60] : memref<1x2x4x128xf32, #tpu.memory_space<vmem>>, vector<1x1x4x128xf32>
    %93 = vector.shape_cast %92 : vector<1x1x4x128xf32> to vector<4x128xf32>
    %94 = vector.shape_cast %19 : vector<4x128xf32> to vector<1x1x4x128xf32>
    tpu.vector_store %arg20[%c0_57, %c0_58, %c0_59, %c0_60], %94 {strides = array<i32>} : memref<1x2x4x128xf32, #tpu.memory_space<vmem>>, vector<1x1x4x128xf32>,
    %c0_61 = arith.constant 0 : index
    %c1 = arith.constant 1 : index
    %c0_62 = arith.constant 0 : index
    %c0_63 = arith.constant 0 : index
    %95 = vector.load %arg20[%c0_61, %c1, %c0_62, %c0_63] : memref<1x2x4x128xf32, #tpu.memory_space<vmem>>, vector<1x1x4x128xf32>
    %96 = vector.shape_cast %95 : vector<1x1x4x128xf32> to vector<4x128xf32>
    %97 = vector.shape_cast %91 : vector<4x128xf32> to vector<1x1x4x128xf32>
    tpu.vector_store %arg20[%c0_61, %c1, %c0_62, %c0_63], %97 {strides = array<i32>} : memref<1x2x4x128xf32, #tpu.memory_space<vmem>>, vector<1x1x4x128xf32>,
    return
  }
  func.func @transform_0(%arg0: i32) -> (i32, i32, i32) {
    %c0_i32 = arith.constant 0 : i32
    %c0_i32_0 = arith.constant 0 : i32
    %c0_i32_1 = arith.constant 0 : i32
    return %arg0, %c0_i32, %c0_i32_0 : i32, i32, i32
  }
  func.func @transform_1(%arg0: i32) -> (i32, i32, i32, i32) {
    %c0_i32 = arith.constant 0 : i32
    %c0_i32_0 = arith.constant 0 : i32
    %c0_i32_1 = arith.constant 0 : i32
    %c0_i32_2 = arith.constant 0 : i32
    return %arg0, %c0_i32, %c0_i32_0, %c0_i32_1 : i32, i32, i32, i32
  }
  func.func @transform_2(%arg0: i32) -> (i32, i32) {
    %c0_i32 = arith.constant 0 : i32
    %c0_i32_0 = arith.constant 0 : i32
    %c0_i32_1 = arith.constant 0 : i32
    return %c0_i32, %c0_i32_0 : i32, i32
  }
  func.func @transform_3(%arg0: i32) -> (i32, i32) {
    %c0_i32 = arith.constant 0 : i32
    %c0_i32_0 = arith.constant 0 : i32
    %c0_i32_1 = arith.constant 0 : i32
    return %c0_i32, %c0_i32_0 : i32, i32
  }
  func.func @transform_4(%arg0: i32) -> (i32, i32) {
    %c0_i32 = arith.constant 0 : i32
    %c0_i32_0 = arith.constant 0 : i32
    %c0_i32_1 = arith.constant 0 : i32
    return %c0_i32, %c0_i32_0 : i32, i32
  }
  func.func @transform_5(%arg0: i32) -> (i32, i32) {
    %c0_i32 = arith.constant 0 : i32
    %c0_i32_0 = arith.constant 0 : i32
    %c0_i32_1 = arith.constant 0 : i32
    return %c0_i32, %c0_i32_0 : i32, i32
  }
  func.func @transform_6(%arg0: i32) -> (i32, i32) {
    %c0_i32 = arith.constant 0 : i32
    %c0_i32_0 = arith.constant 0 : i32
    %c0_i32_1 = arith.constant 0 : i32
    return %c0_i32, %c0_i32_0 : i32, i32
  }
  func.func @transform_7(%arg0: i32) -> (i32, i32) {
    %c0_i32 = arith.constant 0 : i32
    %c0_i32_0 = arith.constant 0 : i32
    %c0_i32_1 = arith.constant 0 : i32
    return %c0_i32, %c0_i32_0 : i32, i32
  }
  func.func @transform_8(%arg0: i32) -> (i32, i32) {
    %c0_i32 = arith.constant 0 : i32
    %c0_i32_0 = arith.constant 0 : i32
    %c0_i32_1 = arith.constant 0 : i32
    return %c0_i32, %c0_i32_0 : i32, i32
  }
  func.func @transform_9(%arg0: i32) -> (i32, i32) {
    %c0_i32 = arith.constant 0 : i32
    %c0_i32_0 = arith.constant 0 : i32
    %c0_i32_1 = arith.constant 0 : i32
    return %c0_i32, %c0_i32_0 : i32, i32
  }
  func.func @transform_10(%arg0: i32) -> (i32, i32) {
    %c0_i32 = arith.constant 0 : i32
    %c0_i32_0 = arith.constant 0 : i32
    %c0_i32_1 = arith.constant 0 : i32
    return %c0_i32, %c0_i32_0 : i32, i32
  }
  func.func @transform_11(%arg0: i32) -> (i32, i32) {
    %c0_i32 = arith.constant 0 : i32
    %c0_i32_0 = arith.constant 0 : i32
    %c0_i32_1 = arith.constant 0 : i32
    return %c0_i32, %c0_i32_0 : i32, i32
  }
  func.func @transform_12(%arg0: i32) -> (i32, i32) {
    %c0_i32 = arith.constant 0 : i32
    %c0_i32_0 = arith.constant 0 : i32
    %c0_i32_1 = arith.constant 0 : i32
    return %c0_i32, %c0_i32_0 : i32, i32
  }
  func.func @transform_13(%arg0: i32) -> (i32, i32) {
    %c0_i32 = arith.constant 0 : i32
    %c0_i32_0 = arith.constant 0 : i32
    %c0_i32_1 = arith.constant 0 : i32
    return %c0_i32, %c0_i32_0 : i32, i32
  }
  func.func @transform_14(%arg0: i32) -> (i32, i32) {
    %c0_i32 = arith.constant 0 : i32
    %c0_i32_0 = arith.constant 0 : i32
    %c0_i32_1 = arith.constant 0 : i32
    return %c0_i32, %c0_i32_0 : i32, i32
  }
  func.func @transform_15(%arg0: i32) -> (i32, i32) {
    %c0_i32 = arith.constant 0 : i32
    %c0_i32_0 = arith.constant 0 : i32
    %c0_i32_1 = arith.constant 0 : i32
    return %c0_i32, %c0_i32_0 : i32, i32
  }
  func.func @transform_16(%arg0: i32) -> (i32, i32) {
    %c0_i32 = arith.constant 0 : i32
    %c0_i32_0 = arith.constant 0 : i32
    %c0_i32_1 = arith.constant 0 : i32
    return %c0_i32, %c0_i32_0 : i32, i32
  }
  func.func @transform_17(%arg0: i32) -> (i32, i32) {
    %c0_i32 = arith.constant 0 : i32
    %c0_i32_0 = arith.constant 0 : i32
    %c0_i32_1 = arith.constant 0 : i32
    return %c0_i32, %c0_i32_0 : i32, i32
  }
  func.func @transform_18(%arg0: i32) -> (i32, i32) {
    %c0_i32 = arith.constant 0 : i32
    %c0_i32_0 = arith.constant 0 : i32
    %c0_i32_1 = arith.constant 0 : i32
    return %c0_i32, %c0_i32_0 : i32, i32
  }
  func.func @transform_19(%arg0: i32) -> (i32, i32, i32, i32) {
    %c0_i32 = arith.constant 0 : i32
    %c0_i32_0 = arith.constant 0 : i32
    %c0_i32_1 = arith.constant 0 : i32
    %c0_i32_2 = arith.constant 0 : i32
    return %arg0, %c0_i32, %c0_i32_0, %c0_i32_1 : i32, i32, i32, i32
  }
}

</mosaic_0001>

<bundles_post_ra>
// kernel: med_clip_forward.1
= control target key start
LH: loop header
LB: loop body
LE: loop exit
PB: predicated region body
PF: predicated region fallthrough
CT: control target
= control target key end

     0   :  { %vm144_vm0 = vcmask 1043456   ;;  %s1361_s2 = inlined_call_operand.vmem [shape: f32[128,128], index: 2, kind: input, shape index: {}]   ;;  %s1362_s6 = inlined_call_operand.vmem [shape: f32[128,128], index: 6, kind: input, shape index: {}]   ;;  %s1363_s3 = inlined_call_operand.vmem [shape: f32[1,128], index: 3, kind: input, shape index: {}]   ;;  %s1364_s4 = inlined_call_operand.vmem [shape: f32[128,128], index: 4, kind: input, shape index: {}]   ;;  %s1365_s0 = inlined_call_operand.vmem [shape: f32[1,4,128], index: 0, kind: input, shape index: {}]   ;;  %s1366_s1 = inlined_call_operand.vmem [shape: f32[1,4,8,128], index: 1, kind: input, shape index: {}]   ;;  %s1367_s7 = inlined_call_operand.vmem [shape: f32[1,128], index: 7, kind: input, shape index: {}]   ;;  %s1368_s5 = inlined_call_operand.vmem [shape: f32[1,128], index: 5, kind: input, shape index: {}]   ;;  %s1369_s8 = inlined_call_operand.vmem [shape: f32[128,128], index: 8, kind: input, shape index: {}]   ;;  %s1370_s9 = inlined_call_operand.vmem [shape: f32[128,128], index: 9, kind: input, shape index: {}]   ;;  %s1371_s10 = inlined_call_operand.vmem [shape: f32[128,128], index: 10, kind: input, shape index: {}]   ;;  %s1372_s12 = inlined_call_operand.vmem [shape: f32[1,128], index: 12, kind: input, shape index: {}]   ;;  %s1373_s19 = inlined_call_operand.vmem [shape: f32[1,2,4,128], index: 19, kind: output, shape index: {}]   ;;  %s1374_s16 = inlined_call_operand.vmem [shape: f32[128,128], index: 16, kind: input, shape index: {}]   ;;  %s1375_s13 = inlined_call_operand.vmem [shape: f32[1,128], index: 13, kind: input, shape index: {}]   ;;  %s1376_s14 = inlined_call_operand.vmem [shape: f32[1,128], index: 14, kind: input, shape index: {}]   ;;  %s1377_s17 = inlined_call_operand.vmem [shape: f32[128,128], index: 17, kind: input, shape index: {}]   ;;  %s1378_s18 = inlined_call_operand.vmem [shape: f32[8,128], index: 18, kind: input, shape index: {}]   ;;  %s1379_s15 = inlined_call_operand.vmem [shape: f32[1,128], index: 15, kind: input, shape index: {}]   ;;  %s1380_s11 = inlined_call_operand.vmem [shape: f32[128,128], index: 11, kind: input, shape index: {}]  }
   0x1   :  { %1384 = sst [smem:[#allocation2_spill]] %s1361_s2  ;;  %v62_v35 = vld [vmem:[%s1365_s0] sm:$0xf]  ;;  %v161_v41 = vld [vmem:[%s1366_s1 + $0x8] sm:$0xff]  ;;  %v162_v46 = vld [vmem:[%s1366_s1 + $0x10] sm:$0xff] }
   0x2   :  { %1385 = sst [smem:[#allocation3_spill]] %s1362_s6  ;;  %v160_v36 = vld [vmem:[%s1366_s1] sm:$0xff]  ;;  %v163_v50 = vld [vmem:[%s1366_s1 + $0x18] sm:$0xff] }
   0x3   :  { %1386 = sst [smem:[#allocation4_spill]] %s1363_s3  ;;  %v694_v56 = vld [vmem:[%s1367_s7] ss:$0 sm:$0xff] }
   0x4   :  { %1387 = sst [smem:[#allocation5_spill]] %s1364_s4 }
   0x5   :  { %1388 = sst [smem:[#allocation6_spill]] %s1375_s13 }
   0x6   :  { %s1389_s20 = sld [smem:[#allocation2_spill]] }
   0x7   :  { %s1390_s13 = sld [smem:[#allocation3_spill]] }
   0x8   :  { %s1391_s21 = sld [smem:[#allocation5_spill]] }
   0x9   :  { %s1393_s29 = sld [smem:[#allocation6_spill]] }
   0xc   :  { %v78_v0 = vld [vmem:[%s1389_s20 + $0x78] sm:$0xff]  ;;  %v77_v2 = vld [vmem:[%s1389_s20 + $0x70] sm:$0xff]  ;;  %v76_v4 = vld [vmem:[%s1389_s20 + $0x68] sm:$0xff] }
   0xd   :  { %v179_v1 = vld [vmem:[%s1390_s13 + $0x78] sm:$0xff]  ;;  %83 = vmatpush.msra.mxu0 %v78_v0  ;;  %v178_v3 = vld [vmem:[%s1390_s13 + $0x70] sm:$0xff]  ;;  %v177_v5 = vld [vmem:[%s1390_s13 + $0x68] sm:$0xff] }
   0xe   :  { %184 = vmatpush.msra.mxu2 %v179_v1  ;;  %v75_v6 = vld [vmem:[%s1389_s20 + $0x60] sm:$0xff]  ;;  %v74_v8 = vld [vmem:[%s1389_s20 + $0x58] sm:$0xff]  ;;  %v73_v10 = vld [vmem:[%s1389_s20 + $0x50] sm:$0xff] }
   0xf   :  { %84 = vmatpush.msra.mxu0 %v77_v2  ;;  %v176_v7 = vld [vmem:[%s1390_s13 + $0x60] sm:$0xff]  ;;  %v175_v9 = vld [vmem:[%s1390_s13 + $0x58] sm:$0xff]  ;;  %v174_v11 = vld [vmem:[%s1390_s13 + $0x50] sm:$0xff] }
  0x10   :  { %185 = vmatpush.msra.mxu2 %v178_v3  ;;  %v72_v12 = vld [vmem:[%s1389_s20 + $0x48] sm:$0xff]  ;;  %v71_v14 = vld [vmem:[%s1389_s20 + $0x40] sm:$0xff]  ;;  %v70_v16 = vld [vmem:[%s1389_s20 + $0x38] sm:$0xff] }
  0x11   :  { %85 = vmatpush.msra.mxu0 %v76_v4  ;;  %v173_v13 = vld [vmem:[%s1390_s13 + $0x48] sm:$0xff]  ;;  %v172_v15 = vld [vmem:[%s1390_s13 + $0x40] sm:$0xff]  ;;  %v171_v17 = vld [vmem:[%s1390_s13 + $0x38] sm:$0xff] }
  0x12   :  { %186 = vmatpush.msra.mxu2 %v177_v5  ;;  %v69_v18 = vld [vmem:[%s1389_s20 + $0x30] sm:$0xff]  ;;  %v68_v20 = vld [vmem:[%s1389_s20 + $0x28] sm:$0xff]  ;;  %v67_v22 = vld [vmem:[%s1389_s20 + $0x20] sm:$0xff] }
  0x13   :  { %86 = vmatpush.msra.mxu0 %v75_v6  ;;  %v170_v19 = vld [vmem:[%s1390_s13 + $0x30] sm:$0xff]  ;;  %v169_v21 = vld [vmem:[%s1390_s13 + $0x28] sm:$0xff]  ;;  %v168_v23 = vld [vmem:[%s1390_s13 + $0x20] sm:$0xff] }
  0x14   :  { %187 = vmatpush.msra.mxu2 %v176_v7  ;;  %v66_v24 = vld [vmem:[%s1389_s20 + $0x18] sm:$0xff]  ;;  %v65_v26 = vld [vmem:[%s1389_s20 + $0x10] sm:$0xff]  ;;  %v64_v30 = vld [vmem:[%s1389_s20 + $0x8] sm:$0xff] }
  0x15   :  { %87 = vmatpush.msra.mxu0 %v74_v8  ;;  %v167_v25 = vld [vmem:[%s1390_s13 + $0x18] sm:$0xff]  ;;  %v166_v27 = vld [vmem:[%s1390_s13 + $0x10] sm:$0xff]  ;;  %v165_v31 = vld [vmem:[%s1390_s13 + $0x8] sm:$0xff] }
  0x16   :  { %188 = vmatpush.msra.mxu2 %v175_v9  ;;  %v118_v28 = vld [vmem:[%s1391_s21 + $0x78] sm:$0xff]  ;;  %v117_v29 = vld [vmem:[%s1391_s21 + $0x70] sm:$0xff]  ;;  %v116_v32 = vld [vmem:[%s1391_s21 + $0x68] sm:$0xff] }
  0x17   :  { %88 = vmatpush.msra.mxu0 %v73_v10  ;;  %123 = vmatpush.msra.mxu1 %v118_v28  ;;  %v63_v33 = vld [vmem:[%s1389_s20] sm:$0xff]  ;;  %v114_v38 = vld [vmem:[%s1391_s21 + $0x58] sm:$0xff]  ;;  %v113_v39 = vld [vmem:[%s1391_s21 + $0x50] sm:$0xff] }
  0x18   :  { %189 = vmatpush.msra.mxu2 %v174_v11  ;;  %v164_v34 = vld [vmem:[%s1390_s13] sm:$0xff]  ;;  %v112_v40 = vld [vmem:[%s1391_s21 + $0x48] sm:$0xff]  ;;  %v110_v43 = vld [vmem:[%s1391_s21 + $0x38] sm:$0xff]  ;;  %s1392_s13 = sld [smem:[#allocation4_spill]] }
  0x19   :  { %89 = vmatpush.msra.mxu0 %v72_v12  ;;  %124 = vmatpush.msra.mxu1 %v117_v29  ;;  %v115_v37 = vld [vmem:[%s1391_s21 + $0x60] sm:$0xff]  ;;  %v109_v44 = vld [vmem:[%s1391_s21 + $0x30] sm:$0xff]  ;;  %v108_v45 = vld [vmem:[%s1391_s21 + $0x28] sm:$0xff] }
  0x1a   :  { %190 = vmatpush.msra.mxu2 %v173_v13  ;;  %v111_v42 = vld [vmem:[%s1391_s21 + $0x40] sm:$0xff]  ;;  %v106_v48 = vld [vmem:[%s1391_s21 + $0x18] sm:$0xff]  ;;  %v105_v49 = vld [vmem:[%s1391_s21 + $0x10] sm:$0xff] }
  0x1b   :  { %90 = vmatpush.msra.mxu0 %v71_v14  ;;  %125 = vmatpush.msra.mxu1 %v116_v32  ;;  %v107_v47 = vld [vmem:[%s1391_s21 + $0x20] sm:$0xff]  ;;  %v104_v51 = vld [vmem:[%s1391_s21 + $0x8] sm:$0xff]  ;;  %v288_v9 = vld [vmem:[%s1369_s8 + $0x78] sm:$0xff] }
  0x1c   :  { %191 = vmatpush.msra.mxu2 %v172_v15  ;;  %v103_v52 = vld [vmem:[%s1391_s21] sm:$0xff]  ;;  %v287_v10 = vld [vmem:[%s1369_s8 + $0x70] sm:$0xff]  ;;  %293 = vmatpush.msra.mxu3 %v288_v9  ;;  %v328_v11 = vld [vmem:[%s1370_s9 + $0x78] sm:$0xff] }
  0x1d   :  { %91 = vmatpush.msra.mxu0 %v70_v16  ;;  %126 = vmatpush.msra.mxu1 %v115_v37  ;;  %v695_v4 = vld [vmem:[%s1368_s5] ss:$0 sm:$0xff]  ;;  %v286_v12 = vld [vmem:[%s1369_s8 + $0x68] sm:$0xff]  ;;  %v377_v13 = vld [vmem:[%s1371_s10 + $0x78] sm:$0xff] }
  0x1e   :  { %192 = vmatpush.msra.mxu2 %v171_v17  ;;  %v693_v53 = vld [vmem:[%s1392_s13] ss:$0 sm:$0xff]  ;;  %294 = vmatpush.msra.mxu3 %v287_v10  ;;  %v284_v16 = vld [vmem:[%s1369_s8 + $0x58] sm:$0xff]  ;;  %v283_v17 = vld [vmem:[%s1369_s8 + $0x50] sm:$0xff] }
  0x1f   :  { %92 = vmatpush.msra.mxu0 %v69_v18  ;;  %127 = vmatpush.msra.mxu1 %v114_v38  ;;  %v285_v15 = vld [vmem:[%s1369_s8 + $0x60] sm:$0xff]  ;;  %v327_v18 = vld [vmem:[%s1370_s9 + $0x70] sm:$0xff]  ;;  %v373_v28 = vld [vmem:[%s1371_s10 + $0x58] sm:$0xff] }
  0x20   :  { %193 = vmatpush.msra.mxu2 %v170_v19  ;;  %295 = vmatpush.msra.mxu3 %v286_v12  ;;  %v376_v19 = vld [vmem:[%s1371_s10 + $0x70] sm:$0xff]  ;;  %v278_v32 = vld [vmem:[%s1369_s8 + $0x28] sm:$0xff]  ;;  %v370_v37 = vld [vmem:[%s1371_s10 + $0x40] sm:$0xff] }
  0x21   :  { %93 = vmatpush.msra.mxu0 %v68_v20  ;;  %128 = vmatpush.msra.mxu1 %v113_v39  ;;  %v282_v20 = vld [vmem:[%s1369_s8 + $0x48] sm:$0xff]  ;;  %v279_v29 = vld [vmem:[%s1369_s8 + $0x30] sm:$0xff]  ;;  %v276_v38 = vld [vmem:[%s1369_s8 + $0x18] sm:$0xff] }
  0x22   :  { %194 = vmatpush.msra.mxu2 %v169_v21  ;;  %296 = vmatpush.msra.mxu3 %v285_v15  ;;  %v326_v21 = vld [vmem:[%s1370_s9 + $0x68] sm:$0xff]  ;;  %v320_v39 = vld [vmem:[%s1370_s9 + $0x38] sm:$0xff] }
  0x23   :  { %94 = vmatpush.msra.mxu0 %v67_v22  ;;  %129 = vmatpush.msra.mxu1 %v112_v40  ;;  %v375_v22 = vld [vmem:[%s1371_s10 + $0x68] sm:$0xff]  ;;  %v369_v40 = vld [vmem:[%s1371_s10 + $0x38] sm:$0xff] }
  0x24   :  { %195 = vmatpush.msra.mxu2 %v168_v23  ;;  %297 = vmatpush.msra.mxu3 %v284_v16  ;;  %v281_v23 = vld [vmem:[%s1369_s8 + $0x40] sm:$0xff] }
  0x25   :  { %95 = vmatpush.msra.mxu0 %v66_v24  ;;  %130 = vmatpush.msra.mxu1 %v111_v42  ;;  %v325_v24 = vld [vmem:[%s1370_s9 + $0x60] sm:$0xff]  ;;  %v319_v42 = vld [vmem:[%s1370_s9 + $0x30] sm:$0xff] }
  0x26   :  { %196 = vmatpush.msra.mxu2 %v167_v25  ;;  %298 = vmatpush.msra.mxu3 %v283_v17  ;;  %v374_v25 = vld [vmem:[%s1371_s10 + $0x60] sm:$0xff] }
  0x27   :  { %96 = vmatpush.msra.mxu0 %v65_v26  ;;  %131 = vmatpush.msra.mxu1 %v110_v43  ;;  %v280_v26 = vld [vmem:[%s1369_s8 + $0x38] sm:$0xff]  ;;  %v368_v43 = vld [vmem:[%s1371_s10 + $0x30] sm:$0xff] }
  0x28   :  { %197 = vmatpush.msra.mxu2 %v166_v27  ;;  %299 = vmatpush.msra.mxu3 %v282_v20  ;;  %v324_v27 = vld [vmem:[%s1370_s9 + $0x58] sm:$0xff] }
  0x29   :  { %97 = vmatpush.msra.mxu0 %v64_v30  ;;  %132 = vmatpush.msra.mxu1 %v109_v44  ;;  %v323_v30 = vld [vmem:[%s1370_s9 + $0x50] sm:$0xff]  ;;  %v274_v44 = vld [vmem:[%s1369_s8 + $0x8] sm:$0xff] }
  0x2a   :  { %198 = vmatpush.msra.mxu2 %v165_v31  ;;  %300 = vmatpush.msra.mxu3 %v281_v23  ;;  %v372_v31 = vld [vmem:[%s1371_s10 + $0x50] sm:$0xff] }
  0x2b   :  { %98 = vmatpush.msra.mxu0 %v63_v33  ;;  %133 = vmatpush.msra.mxu1 %v108_v45  ;;  %v322_v33 = vld [vmem:[%s1370_s9 + $0x48] sm:$0xff] }
  0x2c   :  { %199 = vmatpush.msra.mxu2 %v164_v34  ;;  %99 = vmatmul.f32.vlgmr.msra.gmra.mxu0 %v62_v35  ;;  %v371_v34 = vld [vmem:[%s1371_s10 + $0x48] sm:$0xff]  ;;  %v277_v35 = vld [vmem:[%s1369_s8 + $0x20] sm:$0xff] }
  0x2d   :  { %200 = vmatmul.f32.vlgmr.msra.gmra.mxu2 %v160_v36  ;;  %134 = vmatpush.msra.mxu1 %v107_v47  ;;  %v321_v36 = vld [vmem:[%s1370_s9 + $0x40] sm:$0xff]  ;;  %v318_v45 = vld [vmem:[%s1370_s9 + $0x28] sm:$0xff] }
  0x2e   :  { %333 = vmatpush.msrb.mxu0 %v328_v11  ;;  %301 = vmatpush.msra.mxu3 %v280_v26  ;;  %v273_v47 = vld [vmem:[%s1369_s8] sm:$0xff] }
  0x2f   :  { %135 = vmatpush.msra.mxu1 %v106_v48  ;;  %v317_v48 = vld [vmem:[%s1370_s9 + $0x20] sm:$0xff] }
  0x30   :  { %334 = vmatpush.msrb.mxu0 %v327_v18  ;;  %302 = vmatpush.msra.mxu3 %v279_v29 }
  0x31   :  { %136 = vmatpush.msra.mxu1 %v105_v49  ;;  %v366_v49 = vld [vmem:[%s1371_s10 + $0x20] sm:$0xff] }
  0x32   :  { %335 = vmatpush.msrb.mxu0 %v326_v21  ;;  %303 = vmatpush.msra.mxu3 %v278_v32 }
  0x33   :  { %137 = vmatpush.msra.mxu1 %v104_v51  ;;  %v365_v51 = vld [vmem:[%s1371_s10 + $0x18] sm:$0xff] }
  0x34   :  { %336 = vmatpush.msrb.mxu0 %v325_v24  ;;  %304 = vmatpush.msra.mxu3 %v277_v35 }
  0x35   :  { %203 = vmatmul.f32.gmra.mxu2 %v161_v41  ;;  %138 = vmatpush.msra.mxu1 %v103_v52  ;;  %v275_v41 = vld [vmem:[%s1369_s8 + $0x10] sm:$0xff] }
  0x36   :  { %337 = vmatpush.msrb.mxu0 %v324_v27  ;;  %305 = vmatpush.msra.mxu3 %v276_v38  ;;  %v315_v52 = vld [vmem:[%s1370_s9 + $0x10] sm:$0xff]  ;;  %v442_v27 = vld [vmem:[%s1374_s16 + $0x78] sm:$0xff] }
  0x37   :  { %382 = vmatpush.msrb.mxu1 %v377_v13  ;;  %443 = vmatpush.msrb.mxu2 %v442_v27  ;;  %v557_v27 = vld [vmem:[%s1377_s17 + $0x60] sm:$0xff] }
  0x38   :  { %338 = vmatpush.msrb.mxu0 %v323_v30  ;;  %306 = vmatpush.msra.mxu3 %v275_v41  ;;  %v437_v41 = vld [vmem:[%s1374_s16 + $0x50] sm:$0xff] }
  0x39   :  { %383 = vmatpush.msrb.mxu1 %v376_v19 }
  0x3a   :  { %339 = vmatpush.msrb.mxu0 %v322_v33  ;;  %307 = vmatpush.msra.mxu3 %v274_v44 }
  0x3b   :  { %384 = vmatpush.msrb.mxu1 %v375_v22 }
  0x3c   :  { %340 = vmatpush.msrb.mxu0 %v321_v36  ;;  %308 = vmatpush.msra.mxu3 %v273_v47  ;;  %v434_v47 = vld [vmem:[%s1374_s16 + $0x38] sm:$0xff] }
  0x3d   :  { %206 = vmatmul.f32.gmra.mxu2 %v162_v46  ;;  %385 = vmatpush.msrb.mxu1 %v374_v25  ;;  %v367_v46 = vld [vmem:[%s1371_s10 + $0x28] sm:$0xff] }
  0x3e   :  { %341 = vmatpush.msrb.mxu0 %v320_v39 }
  0x3f   :  { %386 = vmatpush.msrb.mxu1 %v373_v28  ;;  %v441_v28 = vld [vmem:[%s1374_s16 + $0x70] sm:$0xff] }
  0x40   :  { %342 = vmatpush.msrb.mxu0 %v319_v42  ;;  %444 = vmatpush.msrb.mxu2 %v441_v28  ;;  %v556_v28 = vld [vmem:[%s1377_s17 + $0x58] sm:$0xff] }
  0x41   :  { %387 = vmatpush.msrb.mxu1 %v372_v31 }
  0x42   :  { %343 = vmatpush.msrb.mxu0 %v318_v45  ;;  %v435_v45 = vld [vmem:[%s1374_s16 + $0x40] sm:$0xff] }
  0x43   :  { %388 = vmatpush.msrb.mxu1 %v371_v34  ;;  %v439_v34 = vld [vmem:[%s1374_s16 + $0x60] sm:$0xff] }
  0x44   :  { %344 = vmatpush.msrb.mxu0 %v317_v48 }
  0x45   :  { %209 = vmatmul.f32.gmra.mxu2 %v163_v50  ;;  %389 = vmatpush.msrb.mxu1 %v370_v37  ;;  %v316_v50 = vld [vmem:[%s1370_s9 + $0x18] sm:$0xff] }
  0x46   :  { %345 = vmatpush.msrb.mxu0 %v316_v50  ;;  %v438_v37 = vld [vmem:[%s1374_s16 + $0x58] sm:$0xff]  ;;  %v433_v50 = vld [vmem:[%s1374_s16 + $0x30] sm:$0xff] }
  0x47   :  { %390 = vmatpush.msrb.mxu1 %v369_v40 }
  0x48   :  { %346 = vmatpush.msrb.mxu0 %v315_v52 }
  0x49   :  { %391 = vmatpush.msrb.mxu1 %v368_v43 }
  0x4b   :  { %392 = vmatpush.msrb.mxu1 %v367_v46 }
  0x4d   :  { %393 = vmatpush.msrb.mxu1 %v366_v49 }
  0x4f   :  { %394 = vmatpush.msrb.mxu1 %v365_v51 }
  0xa9   :  { %v100_v54 = vpop.f32.mrf.mxu0 }
  0xaa   :  { %v101_v55 = vadd.f32 %v693_v53, %v100_v54  ;;  %v364_v53 = vld [vmem:[%s1371_s10 + $0x10] sm:$0xff]  ;;  %v314_v54 = vld [vmem:[%s1370_s9 + $0x8] sm:$0xff] }
  0xab   :  { %395 = vmatpush.msrb.mxu1 %v364_v53  ;;  %347 = vmatpush.msrb.mxu0 %v314_v54  ;;  %v431_v53 = vld [vmem:[%s1374_s16 + $0x20] sm:$0xff] }
  0xac   :  { %139 = vmatmul.f32.vlgmr.msra.gmra.mxu1 %v101_v55  ;;  %v363_v55 = vld [vmem:[%s1371_s10 + $0x8] sm:$0xff] }
  0xad   :  { %396 = vmatpush.msrb.mxu1 %v363_v55  ;;  %v430_v55 = vld [vmem:[%s1374_s16 + $0x18] sm:$0xff] }
  0xb0   :  { %v201_v57 = vpop.f32.mrf.mxu2 }
  0xb1   :  { %v993_v58 = vadd.f32 %v694_v56, %v201_v57 }
  0xb3   :  { %v213_v14 = vmul.f32 %v993_v58, %v993_v58 }
  0xb8   :  { %v204_v59 = vpop.f32.mrf.mxu2 }
  0xb9   :  { %v995_v60 = vadd.f32 %v694_v56, %v204_v59  ;;  %v362_v59 = vld [vmem:[%s1371_s10] sm:$0xff] }
  0xba   :  { %397 = vmatpush.msrb.mxu1 %v362_v59 }
  0xbb   :  { %v214_v61 = vmul.f32 %v995_v60, %v995_v60 }
  0xbd   :  { %219 = vadd.xlane.f32.xlu1 %v214_v61 }
  0xc0   :  { %v207_v62 = vpop.f32.mrf.mxu2 }
  0xc1   :  { %v999_v63 = vadd.f32 %v694_v56, %v207_v62 }
  0xc3   :  { %v215_v0 = vmul.f32 %v999_v63, %v999_v63 }
  0xc5   :  { %221 = vadd.xlane.f32.xlu1 %v215_v0 }
  0xc8   :  { %v210_v1 = vpop.f32.mrf.mxu2 }
  0xc9   :  { %v1003_v2 = vadd.f32 %v694_v56, %v210_v1  ;;  %v313_v56 = vld [vmem:[%s1370_s9] sm:$0xff] }
  0xca   :  { %348 = vmatpush.msrb.mxu0 %v313_v56 }
  0xcb   :  { %v216_v3 = vmul.f32 %v1003_v2, %v1003_v2 }
  0xcd   :  { %223 = vadd.xlane.f32.xlu2 %v216_v3 }
 0x129   :  { %v140_v5 = vpop.f32.mrf.mxu1 }
 0x12a   :  { %v1010_v6 = vadd.f32 %v695_v4, %v140_v5 }
 0x12c   :  { %v143_v7 = vmul.f32 %v1010_v6, %v1010_v6 }
 0x12e   :  { %v145_v8 = vsel %vm144_vm0, %v143_v7, 0.0 }
 0x12f   :  { %146 = vadd.xlane.f32.xlu0 %v145_v8 }
 0x130   :  { %v220_v57 = vpop.xlane.xlu1 %219 }
 0x131   :  { %v1161_v62 = vmax.f32 %v220_v57, 1e-24 }
 0x133   :  { %vm245_vm7 = vweird.f32 %v1161_v62 }
 0x137   :  { %217 = vadd.xlane.f32.xlu0 %v213_v14 }
 0x138   :  { %v222_v1 = vpop.xlane.xlu1 %221 }
 0x139   :  { %v1164_v5 = vmax.f32 %v222_v1, 1e-24 }
 0x13b   :  { %vm255_vm10 = vweird.f32 %v1164_v5 }
 0x140   :  { %v224_v12 = vpop.xlane.xlu2 %223 }
 0x141   :  { %v1171_v16 = vmax.f32 %v224_v12, 1e-24 }
 0x143   :  { %vm265_vm13 = vweird.f32 %v1171_v16 }
 0x1a2   :  { %v147_v61 = vpop.xlane.xlu0 %146 }
 0x1a3   :  { %v148_v0 = vmax.f32 %v147_v61, 1e-24  ;;  %v429_v61 = vld [vmem:[%s1374_s16 + $0x10] sm:$0xff] }
 0x1a5   :  { %700 = vrsqrt.f32 %v148_v0  ;;  %vm155_vm2 = vweird.f32 %v148_v0 }
 0x1a6   :  { %702 = vrsqrt.f32 %v1161_v62 }
 0x1aa   :  { %v218_v3 = vpop.xlane.xlu0 %217 }
 0x1ab   :  { %v701_v4 = vpop.eup %700  ;;  %v225_v7 = vmax.f32 %v218_v3, 1e-24 }
 0x1ac   :  { %v150_v8 = vmul.f32 %v701_v4, %v148_v0  ;;  %v1166_v9 = vpop.eup %702  ;;  %vm156_vm1 = vweird.f32 %v701_v4  ;;  %v697_v0 = vld [vmem:[%s1393_s29] ss:$0 sm:$0xff] }
 0x1ad   :  { %704 = vrsqrt.f32 %v225_v7  ;;  %v240_v11 = vmul.f32 %v1166_v9, %v1161_v62  ;;  %vm157_vm3 = vmor %vm155_vm2, %vm156_vm1  ;;  %vm235_vm5 = vweird.f32 %v225_v7  ;;  %vm246_vm8 = vweird.f32 %v1166_v9  ;;  %v427_v62 = vld [vmem:[%s1374_s16] sm:$0xff] }
 0x1ae   :  { %v151_v10 = vmul.f32 %v701_v4, %v150_v8  ;;  %706 = vrsqrt.f32 %v1164_v5  ;;  %vm247_vm9 = vmor %vm245_vm7, %vm246_vm8  ;;  %vm642_vm1 = vcmask 1041409   ;;  %vm644_vm2 = vcmask 1042434  }
 0x1af   :  { %v241_v17 = vmul.f32 %v1166_v9, %v240_v11  ;;  %708 = vrsqrt.f32 %v1171_v16 }
 0x1b0   :  { %v152_v13 = vmul.f32 0.5, %v151_v10 }
 0x1b1   :  { %v242_v24 = vmul.f32 0.5, %v241_v17 }
 0x1b2   :  { %v153_v14 = vsub.f32 1.5, %v152_v13 }
 0x1b3   :  { %v705_v15 = vpop.eup %704  ;;  %v243_v30 = vsub.f32 1.5, %v242_v24  ;;  %v560_v24 = vld [vmem:[%s1377_s17 + $0x78] sm:$0xff] }
 0x1b4   :  { %v230_v18 = vmul.f32 %v705_v15, %v225_v7  ;;  %v154_v19 = vmul.f32 %v701_v4, %v153_v14  ;;  %v1174_v20 = vpop.eup %706  ;;  %vm236_vm4 = vweird.f32 %v705_v15  ;;  %561 = vmatpush.msrb.mxu3 %v560_v24 }
 0x1b5   :  { %v250_v25 = vmul.f32 %v1174_v20, %v1164_v5  ;;  %v709_v33 = vpop.eup %708  ;;  %vm237_vm6 = vmor %vm235_vm5, %vm236_vm4  ;;  %v244_v40 = vmul.f32 %v1166_v9, %v243_v30  ;;  %vm256_vm11 = vweird.f32 %v1174_v20  ;;  %v472_v30 = vld [vmem:[%s1378_s18] sm:$0xff] }
 0x1b6   :  { %v231_v21 = vmul.f32 %v705_v15, %v230_v18  ;;  %v158_v22 = vsel %vm157_vm3, %v701_v4, %v154_v19  ;;  %v260_v39 = vmul.f32 %v709_v33, %v1171_v16  ;;  %vm257_vm12 = vmor %vm255_vm10, %vm256_vm11  ;;  %vm266_vm14 = vweird.f32 %v709_v33 }
 0x1b7   :  { %v159_v23 = vmul.f32 %v158_v22, %v1010_v6  ;;  %v440_v6 = vld [vmem:[%s1374_s16 + $0x68] sm:$0xff]  ;;  %v251_v31 = vmul.f32 %v1174_v20, %v250_v25  ;;  %v248_v44 = vsel %vm247_vm9, %v1166_v9, %v244_v40  ;;  %vm267_vm15 = vmor %vm265_vm13, %vm266_vm14  ;;  %v559_v25 = vld [vmem:[%s1377_s17 + $0x70] sm:$0xff]  ;;  %vm646_vm3 = vcmask 1043459  }
 0x1b8   :  { %v232_v26 = vmul.f32 0.5, %v231_v21  ;;  %445 = vmatpush.msrb.mxu2 %v440_v6  ;;  %v261_v43 = vmul.f32 %v709_v33, %v260_v39  ;;  %v270_v46 = vmul.f32 %v248_v44, %v995_v60  ;;  %v432_v60 = vld [vmem:[%s1374_s16 + $0x28] sm:$0xff]  ;;  %562 = vmatpush.msrb.mxu3 %v559_v25  ;;  %v549_v39 = vld [vmem:[%s1377_s17 + $0x20] sm:$0xff]  ;;  %v547_v44 = vld [vmem:[%s1377_s17 + $0x10] sm:$0xff] }
 0x1b9   :  { %309 = vmatmul.f32.vlgmr.msra.gmra.mxu3 %v159_v23  ;;  %685 = vst [vmem:[%s1373_s19] sm:$0xf] %v159_v23  ;;  %v252_v38 = vmul.f32 0.5, %v251_v31  ;;  %v554_v6 = vld [vmem:[%s1377_s17 + $0x48] sm:$0xff]  ;;  %v553_v31 = vld [vmem:[%s1377_s17 + $0x40] sm:$0xff] }
 0x1ba   :  { %v233_v29 = vsub.f32 1.5, %v232_v26  ;;  %446 = vmatpush.msrb.mxu2 %v439_v34  ;;  %v262_v48 = vmul.f32 0.5, %v261_v43  ;;  %v558_v26 = vld [vmem:[%s1377_s17 + $0x68] sm:$0xff] }
 0x1bb   :  { %v253_v42 = vsub.f32 1.5, %v252_v38  ;;  %563 = vmatpush.msrb.mxu3 %v558_v26 }
 0x1bc   :  { %v234_v32 = vmul.f32 %v705_v15, %v233_v29  ;;  %447 = vmatpush.msrb.mxu2 %v438_v37  ;;  %v263_v51 = vsub.f32 1.5, %v262_v48  ;;  %v555_v29 = vld [vmem:[%s1377_s17 + $0x50] sm:$0xff]  ;;  %v550_v37 = vld [vmem:[%s1377_s17 + $0x28] sm:$0xff]  ;;  %v545_v48 = vld [vmem:[%s1377_s17] sm:$0xff] }
 0x1bd   :  { %v254_v49 = vmul.f32 %v1174_v20, %v253_v42  ;;  %564 = vmatpush.msrb.mxu3 %v557_v27 }
 0x1be   :  { %v238_v35 = vsel %vm237_vm6, %v705_v15, %v234_v32  ;;  %448 = vmatpush.msrb.mxu2 %v437_v41  ;;  %v264_v56 = vmul.f32 %v709_v33, %v263_v51 }
 0x1bf   :  { %v269_v36 = vmul.f32 %v238_v35, %v993_v58  ;;  %v436_v58 = vld [vmem:[%s1374_s16 + $0x48] sm:$0xff]  ;;  %v258_v52 = vsel %vm257_vm12, %v1174_v20, %v254_v49  ;;  %565 = vmatpush.msrb.mxu3 %v556_v28  ;;  %v551_v35 = vld [vmem:[%s1377_s17 + $0x30] sm:$0xff] }
 0x1c0   :  { %449 = vmatpush.msrb.mxu2 %v436_v58  ;;  %v271_v54 = vmul.f32 %v258_v52, %v999_v63  ;;  %v268_v57 = vsel %vm267_vm15, %v709_v33, %v264_v56  ;;  %v428_v63 = vld [vmem:[%s1374_s16 + $0x8] sm:$0xff]  ;;  %v552_v33 = vld [vmem:[%s1377_s17 + $0x38] sm:$0xff] }
 0x1c1   :  { %349 = vmatmul.f32.vlgmr.msrb.gmra.mxu0 %v269_v36  ;;  %398 = vmatmul.f32.vlgmr.msrb.gmra.mxu1 %v269_v36  ;;  %v272_v59 = vmul.f32 %v268_v57, %v1003_v2  ;;  %v696_v2 = vld [vmem:[%s1372_s12] ss:$0 sm:$0xff]  ;;  %v548_v58 = vld [vmem:[%s1377_s17 + $0x18] sm:$0xff] }
 0x1c2   :  { %450 = vmatpush.msrb.mxu2 %v435_v45  ;;  %566 = vmatpush.msrb.mxu3 %v555_v29 }
 0x1c4   :  { %451 = vmatpush.msrb.mxu2 %v434_v47  ;;  %567 = vmatpush.msrb.mxu3 %v554_v6  ;;  %v546_v47 = vld [vmem:[%s1377_s17 + $0x8] sm:$0xff] }
 0x1c6   :  { %452 = vmatpush.msrb.mxu2 %v433_v50  ;;  %568 = vmatpush.msrb.mxu3 %v553_v31 }
 0x1c8   :  { %453 = vmatpush.msrb.mxu2 %v432_v60  ;;  %569 = vmatpush.msrb.mxu3 %v552_v33 }
 0x1c9   :  { %352 = vmatmul.f32.gmra.mxu0 %v270_v46  ;;  %401 = vmatmul.f32.gmra.mxu1 %v270_v46 }
 0x1ca   :  { %454 = vmatpush.msrb.mxu2 %v431_v53  ;;  %570 = vmatpush.msrb.mxu3 %v551_v35 }
 0x1cc   :  { %455 = vmatpush.msrb.mxu2 %v430_v55  ;;  %571 = vmatpush.msrb.mxu3 %v550_v37 }
 0x1ce   :  { %456 = vmatpush.msrb.mxu2 %v429_v61  ;;  %572 = vmatpush.msrb.mxu3 %v549_v39 }
 0x1d0   :  { %457 = vmatpush.msrb.mxu2 %v428_v63  ;;  %573 = vmatpush.msrb.mxu3 %v548_v58 }
 0x1d1   :  { %355 = vmatmul.f32.gmra.mxu0 %v271_v54  ;;  %404 = vmatmul.f32.gmra.mxu1 %v271_v54 }
 0x1d2   :  { %458 = vmatpush.msrb.mxu2 %v427_v62  ;;  %574 = vmatpush.msrb.mxu3 %v547_v44 }
 0x1d4   :  { %575 = vmatpush.msrb.mxu3 %v546_v47 }
 0x1d6   :  { %576 = vmatpush.msrb.mxu3 %v545_v48 }
 0x1d9   :  { %358 = vmatmul.f32.gmra.mxu0 %v272_v59  ;;  %407 = vmatmul.f32.gmra.mxu1 %v272_v59 }
 0x23c   :  { %v310_v1 = vpop.f32.mrf.mxu3 }
 0x23d   :  { %v311_v3 = vadd.f32 %v696_v2, %v310_v1 }
 0x23e   :  { %v350_v4 = vpop.f32.mrf.mxu0 }
 0x23f   :  { %v351_v5 = vadd.f32 %v697_v0, %v350_v4  ;;  %v415_v7 = vperm.slane %v311_v3, 0  ;;  %v412_v9 = vrot.slane %v311_v3, 1  ;;  %v413_v14 = vrot.slane %v311_v3, 2 }
 0x240   :  { %v414_v19 = vrot.slane %v311_v3, 3 }
 0x241   :  { %v423_v8 = vmul.f32 %v415_v7, %v351_v5  ;;  %v416_v12 = vperm.slane %v412_v9, 0  ;;  %v417_v17 = vperm.slane %v413_v14, 0 }
 0x242   :  { %v418_v22 = vperm.slane %v414_v19, 0 }
 0x243   :  { %459 = vmatmul.f32.vlgmr.msrb.gmra.mxu2 %v423_v8 }
 0x246   :  { %v353_v10 = vpop.f32.mrf.mxu0 }
 0x247   :  { %v354_v11 = vadd.f32 %v697_v0, %v353_v10 }
 0x249   :  { %v424_v13 = vmul.f32 %v416_v12, %v354_v11 }
 0x24b   :  { %462 = vmatmul.f32.gmra.mxu2 %v424_v13 }
 0x24e   :  { %v356_v15 = vpop.f32.mrf.mxu0 }
 0x24f   :  { %v357_v16 = vadd.f32 %v697_v0, %v356_v15 }
 0x251   :  { %v425_v18 = vmul.f32 %v417_v17, %v357_v16 }
 0x253   :  { %465 = vmatmul.f32.gmra.mxu2 %v425_v18 }
 0x256   :  { %v359_v20 = vpop.f32.mrf.mxu0 }
 0x257   :  { %v360_v21 = vadd.f32 %v697_v0, %v359_v20 }
 0x259   :  { %v426_v23 = vmul.f32 %v418_v22, %v360_v21 }
 0x25b   :  { %468 = vmatmul.f32.gmra.mxu2 %v426_v23 }
 0x2c6   :  { %v460_v32 = vpop.f32.mrf.mxu2 }
 0x2c7   :  { %v473_v34 = vadd.f32 %v472_v30, %v460_v32 }
 0x2c9   :  { %v477_v36 = vrot.slane %v473_v34, 4 }
 0x2cb   :  { %v478_v38 = vmax.f32 %v473_v34, %v477_v36 }
 0x2cd   :  { %v479_v40 = vrot.slane %v478_v38, 2 }
 0x2ce   :  { %v463_v41 = vpop.f32.mrf.mxu2 }
 0x2cf   :  { %v480_v42 = vmax.f32 %v478_v38, %v479_v40  ;;  %v474_v43 = vadd.f32 %v472_v30, %v463_v41 }
 0x2d1   :  { %v481_v45 = vrot.slane %v480_v42, 1  ;;  %v483_v46 = vrot.slane %v474_v43, 4 }
 0x2d3   :  { %v482_v49 = vmax.f32 %v480_v42, %v481_v45  ;;  %v484_v50 = vmax.f32 %v474_v43, %v483_v46 }
 0x2d5   :  { %v501_v60 = vsub.f32 %v473_v34, %v482_v49  ;;  %v485_v51 = vrot.slane %v484_v50, 2 }
 0x2d6   :  { %v466_v52 = vpop.f32.mrf.mxu2 }
 0x2d7   :  { %v505_v53 = vmul.f32 1.442695, %v501_v60  ;;  %v486_v54 = vmax.f32 %v484_v50, %v485_v51  ;;  %v475_v55 = vadd.f32 %v472_v30, %v466_v52  ;;  %v633_v60 = vld [vmem:[%s1380_s11 + $0x78] sm:$0xff]  ;;  %v632_v51 = vld [vmem:[%s1380_s11 + $0x70] sm:$0xff]  ;;  %v631_v52 = vld [vmem:[%s1380_s11 + $0x68] sm:$0xff] }
 0x2d8   :  { %649 = vmatpush.msra.mxu0 %v633_v60 }
 0x2d9   :  { %710 = vpow2.f32 %v505_v53  ;;  %v487_v56 = vrot.slane %v486_v54, 1  ;;  %v489_v57 = vrot.slane %v475_v55, 4  ;;  %v630_v53 = vld [vmem:[%s1380_s11 + $0x60] sm:$0xff] }
 0x2da   :  { %650 = vmatpush.msra.mxu0 %v632_v51 }
 0x2db   :  { %v488_v59 = vmax.f32 %v486_v54, %v487_v56  ;;  %v490_v61 = vmax.f32 %v475_v55, %v489_v57  ;;  %v629_v54 = vld [vmem:[%s1380_s11 + $0x58] sm:$0xff]  ;;  %v627_v56 = vld [vmem:[%s1380_s11 + $0x48] sm:$0xff]  ;;  %v399_v57 = vpop.f32.mrf.mxu1 }
 0x2dc   :  { %651 = vmatpush.msra.mxu0 %v631_v52 }
 0x2dd   :  { %v502_v63 = vsub.f32 %v474_v43, %v488_v59  ;;  %v491_v62 = vrot.slane %v490_v61, 2  ;;  %v626_v59 = vld [vmem:[%s1380_s11 + $0x40] sm:$0xff] }
 0x2de   :  { %v469_v2 = vpop.f32.mrf.mxu2  ;;  %652 = vmatpush.msra.mxu0 %v630_v53 }
 0x2df   :  { %v711_v0 = vpop.eup %710  ;;  %v507_v1 = vmul.f32 1.442695, %v502_v63  ;;  %v492_v3 = vmax.f32 %v490_v61, %v491_v62  ;;  %v476_v4 = vadd.f32 %v472_v30, %v469_v2  ;;  %v625_v61 = vld [vmem:[%s1380_s11 + $0x38] sm:$0xff]  ;;  %v624_v63 = vld [vmem:[%s1380_s11 + $0x30] sm:$0xff]  ;;  %v623_v62 = vld [vmem:[%s1380_s11 + $0x28] sm:$0xff] }
 0x2e0   :  { %v513_v5 = vrot.slane %v711_v0, 4  ;;  %653 = vmatpush.msra.mxu0 %v629_v54  ;;  %v622_v2 = vld [vmem:[%s1380_s11 + $0x20] sm:$0xff] }
 0x2e1   :  { %712 = vpow2.f32 %v507_v1  ;;  %v493_v7 = vrot.slane %v492_v3, 1  ;;  %v495_v8 = vrot.slane %v476_v4, 4 }
 0x2e2   :  { %v514_v9 = vadd.f32 %v711_v0, %v513_v5  ;;  %v698_v5 = vld [vmem:[%s1376_s14] ss:$0 sm:$0xff] }
 0x2e3   :  { %v494_v10 = vmax.f32 %v492_v3, %v493_v7  ;;  %v496_v11 = vmax.f32 %v476_v4, %v495_v8  ;;  %v621_v3 = vld [vmem:[%s1380_s11 + $0x18] sm:$0xff]  ;;  %v619_v7 = vld [vmem:[%s1380_s11 + $0x8] sm:$0xff]  ;;  %v618_v8 = vld [vmem:[%s1380_s11] sm:$0xff] }
 0x2e4   :  { %v515_v12 = vrot.slane %v514_v9, 2 }
 0x2e5   :  { %v503_v13 = vsub.f32 %v475_v55, %v494_v10  ;;  %v497_v14 = vrot.slane %v496_v11, 2  ;;  %v628_v55 = vld [vmem:[%s1380_s11 + $0x50] sm:$0xff] }
 0x2e6   :  { %v516_v15 = vadd.f32 %v515_v12, %v514_v9  ;;  %654 = vmatpush.msra.mxu0 %v628_v55 }
 0x2e7   :  { %v713_v16 = vpop.eup %712  ;;  %v509_v17 = vmul.f32 1.442695, %v503_v13  ;;  %v498_v18 = vmax.f32 %v496_v11, %v497_v14  ;;  %v400_v11 = vadd.f32 %v698_v5, %v399_v57 }
 0x2e8   :  { %v517_v19 = vrot.slane %v516_v15, 1  ;;  %v519_v20 = vrot.slane %v713_v16, 4  ;;  %655 = vmatpush.msra.mxu0 %v627_v56 }
 0x2e9   :  { %714 = vpow2.f32 %v509_v17  ;;  %v499_v21 = vrot.slane %v498_v18, 1 }
 0x2ea   :  { %v518_v22 = vadd.f32 %v517_v19, %v516_v15  ;;  %v520_v23 = vadd.f32 %v713_v16, %v519_v20  ;;  %656 = vmatpush.msra.mxu0 %v626_v59 }
 0x2eb   :  { %v500_v24 = vmax.f32 %v498_v18, %v499_v21 }
 0x2ec   :  { %716 = vrcp.f32 %v518_v22  ;;  %v521_v25 = vrot.slane %v520_v23, 2  ;;  %657 = vmatpush.msra.mxu0 %v625_v61 }
 0x2ed   :  { %v504_v26 = vsub.f32 %v476_v4, %v500_v24  ;;  %v620_v4 = vld [vmem:[%s1380_s11 + $0x10] sm:$0xff] }
 0x2ee   :  { %v522_v27 = vadd.f32 %v521_v25, %v520_v23  ;;  %658 = vmatpush.msra.mxu0 %v624_v63 }
 0x2ef   :  { %v715_v28 = vpop.eup %714  ;;  %v511_v29 = vmul.f32 1.442695, %v504_v26 }
 0x2f0   :  { %v523_v6 = vrot.slane %v522_v27, 1  ;;  %v525_v30 = vrot.slane %v715_v28, 4  ;;  %659 = vmatpush.msra.mxu0 %v623_v62 }
 0x2f1   :  { %718 = vpow2.f32 %v511_v29 }
 0x2f2   :  { %v717_v31 = vpop.eup %716  ;;  %v524_v32 = vadd.f32 %v523_v6, %v522_v27  ;;  %v526_v33 = vadd.f32 %v715_v28, %v525_v30  ;;  %660 = vmatpush.msra.mxu0 %v622_v2 }
 0x2f3   :  { %v541_v34 = vmul.f32 %v717_v31, %v711_v0  ;;  %v402_v0 = vpop.f32.mrf.mxu1 }
 0x2f4   :  { %720 = vrcp.f32 %v524_v32  ;;  %v527_v35 = vrot.slane %v526_v33, 2  ;;  %661 = vmatpush.msra.mxu0 %v621_v3  ;;  %v403_v9 = vadd.f32 %v698_v5, %v402_v0 }
 0x2f5   :  { %577 = vmatmul.f32.vlgmr.msrb.gmra.mxu3 %v541_v34 }
 0x2f6   :  { %v528_v36 = vadd.f32 %v527_v35, %v526_v33  ;;  %662 = vmatpush.msra.mxu0 %v620_v4 }
 0x2f7   :  { %v719_v37 = vpop.eup %718 }
 0x2f8   :  { %v529_v38 = vrot.slane %v528_v36, 1  ;;  %v531_v39 = vrot.slane %v719_v37, 4  ;;  %663 = vmatpush.msra.mxu0 %v619_v7 }
 0x2fa   :  { %v721_v40 = vpop.eup %720  ;;  %v530_v41 = vadd.f32 %v529_v38, %v528_v36  ;;  %v532_v58 = vadd.f32 %v719_v37, %v531_v39  ;;  %664 = vmatpush.msra.mxu0 %v618_v8 }
 0x2fb   :  { %v542_v42 = vmul.f32 %v721_v40, %v713_v16  ;;  %v405_v13 = vpop.f32.mrf.mxu1 }
 0x2fc   :  { %722 = vrcp.f32 %v530_v41  ;;  %v533_v43 = vrot.slane %v532_v58, 2  ;;  %v406_v16 = vadd.f32 %v698_v5, %v405_v13 }
 0x2fd   :  { %580 = vmatmul.f32.gmra.mxu3 %v542_v42 }
 0x2fe   :  { %v534_v44 = vadd.f32 %v533_v43, %v532_v58 }
 0x300   :  { %v535_v45 = vrot.slane %v534_v44, 1 }
 0x302   :  { %v723_v46 = vpop.eup %722  ;;  %v536_v47 = vadd.f32 %v535_v45, %v534_v44 }
 0x303   :  { %v543_v48 = vmul.f32 %v723_v46, %v715_v28  ;;  %v408_v23 = vpop.f32.mrf.mxu1 }
 0x304   :  { %724 = vrcp.f32 %v536_v47  ;;  %v409_v26 = vadd.f32 %v698_v5, %v408_v23  ;;  %v699_v47 = vld [vmem:[%s1379_s15] ss:$0 sm:$0xff] }
 0x305   :  { %583 = vmatmul.f32.gmra.mxu3 %v543_v48 }
 0x30a   :  { %v725_v49 = vpop.eup %724 }
 0x30b   :  { %v544_v50 = vmul.f32 %v725_v49, %v719_v37 }
 0x30d   :  { %586 = vmatmul.f32.gmra.mxu3 %v544_v50 }
 0x378   :  { %v578_v1 = vpop.f32.mrf.mxu3 }
 0x379   :  { %v590_v14 = vmul.f32 %v578_v1, %v400_v11 }
 0x37b   :  { %v594_v17 = vrot.slane %v590_v14, 4 }
 0x37d   :  { %v595_v21 = vadd.f32 %v594_v17, %v590_v14 }
 0x37f   :  { %v596_v27 = vrot.slane %v595_v21, 2 }
 0x380   :  { %v581_v10 = vpop.f32.mrf.mxu3 }
 0x381   :  { %v591_v12 = vmul.f32 %v581_v10, %v403_v9  ;;  %v597_v32 = vadd.f32 %v596_v27, %v595_v21 }
 0x383   :  { %v600_v15 = vrot.slane %v591_v12, 4  ;;  %v598_v37 = vrot.slane %v597_v32, 1 }
 0x385   :  { %v601_v19 = vadd.f32 %v600_v15, %v591_v12  ;;  %v599_v58 = vadd.f32 %v598_v37, %v597_v32 }
 0x387   :  { %v602_v24 = vrot.slane %v601_v19, 2 }
 0x388   :  { %v584_v18 = vpop.f32.mrf.mxu3 }
 0x389   :  { %v592_v20 = vmul.f32 %v584_v18, %v406_v16  ;;  %v603_v6 = vadd.f32 %v602_v24, %v601_v19 }
 0x38b   :  { %v606_v22 = vrot.slane %v592_v20, 4  ;;  %v604_v34 = vrot.slane %v603_v6, 1 }
 0x38d   :  { %v607_v25 = vadd.f32 %v606_v22, %v592_v20  ;;  %v605_v39 = vadd.f32 %v604_v34, %v603_v6 }
 0x38f   :  { %v608_v28 = vrot.slane %v607_v25, 2  ;;  %v643_v44 = vsel %vm642_vm1, %v605_v39, %v599_v58 }
 0x390   :  { %v587_v29 = vpop.f32.mrf.mxu3 }
 0x391   :  { %v593_v30 = vmul.f32 %v587_v29, %v409_v26  ;;  %v609_v31 = vadd.f32 %v608_v28, %v607_v25 }
 0x393   :  { %v612_v33 = vrot.slane %v593_v30, 4  ;;  %v610_v36 = vrot.slane %v609_v31, 1 }
 0x395   :  { %v613_v35 = vadd.f32 %v612_v33, %v593_v30  ;;  %v611_v41 = vadd.f32 %v610_v36, %v609_v31 }
 0x397   :  { %v614_v38 = vrot.slane %v613_v35, 2  ;;  %v645_v45 = vsel %vm644_vm2, %v611_v41, %v643_v44 }
 0x399   :  { %v615_v40 = vadd.f32 %v614_v38, %v613_v35 }
 0x39b   :  { %v616_v42 = vrot.slane %v615_v40, 1 }
 0x39d   :  { %v617_v43 = vadd.f32 %v616_v42, %v615_v40 }
 0x39f   :  { %v647_v46 = vsel %vm646_vm3, %v617_v43, %v645_v45 }
 0x3a0   :  { %665 = vmatmul.f32.vlgmr.msra.gmra.mxu0 %v647_v46 }
 0x41d   :  { %v666_v48 = vpop.f32.mrf.mxu0 }
 0x41e   :  { %v667_v49 = vadd.f32 %v699_v47, %v666_v48 }
 0x420   :  { %v669_v50 = vmul.f32 %v667_v49, %v667_v49 }
 0x422   :  { %v670_v60 = vsel %vm144_vm0, %v669_v50, 0.0 }
 0x423   :  { %671 = vadd.xlane.f32.xlu2 %v670_v60 }
 0x496   :  { %v672_v51 = vpop.xlane.xlu2 %671 }
 0x497   :  { %v673_v52 = vmax.f32 %v672_v51, 1e-24 }
 0x499   :  { %726 = vrsqrt.f32 %v673_v52  ;;  %vm680_vm5 = vweird.f32 %v673_v52 }
 0x49f   :  { %v727_v53 = vpop.eup %726 }
 0x4a0   :  { %v675_v54 = vmul.f32 %v727_v53, %v673_v52  ;;  %vm681_vm4 = vweird.f32 %v727_v53 }
 0x4a1   :  { %vm682_vm6 = vmor %vm680_vm5, %vm681_vm4 }
 0x4a2   :  { %v676_v55 = vmul.f32 %v727_v53, %v675_v54 }
 0x4a4   :  { %v677_v56 = vmul.f32 0.5, %v676_v55 }
 0x4a6   :  { %v678_v57 = vsub.f32 1.5, %v677_v56 }
 0x4a8   :  { %v679_v59 = vmul.f32 %v727_v53, %v678_v57 }
 0x4aa   :  { %v683_v61 = vsel %vm682_vm6, %v727_v53, %v679_v59 }
 0x4ab   :  { %v684_v63 = vmul.f32 %v683_v61, %v667_v49 }
 0x4ad   :  { %692 = vst [vmem:[%s1373_s19 + $0x4] sm:$0xf] %v684_v63 }

</bundles_post_ra>
